<compile_context>
chip_gen: v7x
topology: tpu7x:2x2x1
jax: 0.10.0
libtpu: 0.0.40
codegen_flags: <defaults>
</compile_context>

<pallas_src>
import functools

import jax
import jax.numpy as jnp
from jax import lax
from jax.experimental import pallas as pl
from jax.experimental.pallas import tpu as pltpu

ALPHA = 1
GAMMA = 2

_REDUCE_BLOCK_BYTES = 4 << 20   # ~4 MiB of f32 per reduce input block
_ELEM_BLOCK_BYTES = 2 << 20     # ~2 MiB per elementwise block (v5e-safe)


def _cdiv(a, b):
    return -(-a // b)


def _num_tensorcores():
    """TensorCores per chip (2 on v7x, 1 on v5e/v6e); safe default 1."""
    # TODO(synk): verify with an xprof trace that the outer "parallel" axis
    # actually lands on both v7x TensorCores; if not, switch that axis to
    # pltpu.CORE_PARALLEL (or drive it via pl.core_map over a 2-core mesh).
    try:
        info = pltpu.get_tpu_info()
    except Exception:
        return 1
    for attr in ("num_cores", "core_count", "num_tensorcores",
                 "tensor_cores_per_chip", "cores_per_chip"):
        val = getattr(info, attr, None)
        if isinstance(val, int) and 1 <= val <= 8:
            return val
    return 1


def _pow_gamma(x, gamma):
    """(1 - pt) ** gamma without transcendental pow for integer gamma."""
    if float(gamma) == int(gamma):
        return lax.integer_pow(x, int(gamma))
    # Non-integer gamma: EUP pow fallback (NaN for negative base when
    # ce < 0, matching the PyTorch reference).
    return jnp.power(x, gamma)


def _focal(ce, alpha, gamma):
    pt = jnp.exp(-ce)
    fl = _pow_gamma(1.0 - pt, gamma) * ce
    if float(alpha) != 1.0:
        fl = alpha * fl
    return fl


def _focal_elem_kernel(ce_ref, out_ref, *, alpha, gamma):
    ce = ce_ref[...].astype(jnp.float32)
    out_ref[...] = _focal(ce, alpha, gamma).astype(out_ref.dtype)


def _focal_reduce_kernel(ce_ref, out_ref, acc_ref, *, alpha, gamma, scale,
                         n_valid, block_elems, blocks_per_part,
                         num_full_blocks, lanes, acc_sublanes):
    j = pl.program_id(1)

    @pl.when(j == 0)
    def _init():
        acc_ref[...] = jnp.zeros_like(acc_ref)

    ce = ce_ref[...].astype(jnp.float32)
    fl = _focal(ce, alpha, gamma)

    b = pl.program_id(0) * blocks_per_part + j      # unclamped block index

    def _accumulate(x):
        if acc_sublanes == 8:
            # Fold block rows onto 8 sublanes: pure VPU adds, no XLU.
            acc_ref[...] += x.reshape(-1, 8, lanes).sum(axis=0)
        else:
            acc_ref[...] += x.sum(axis=0, keepdims=True)

    # Only the ragged tail block and clamped / duplicated blocks (b >=
    # num_full_blocks) pay for the mask; full in-range blocks skip it.
    needs_mask = b >= num_full_blocks

    @pl.when(needs_mask)
    def _masked():
        rem = n_valid - b * block_elems             # int32; n < 2**31 enforced
        row = lax.broadcasted_iota(jnp.int32, fl.shape, 0)
        col = lax.broadcasted_iota(jnp.int32, fl.shape, 1)
        idx = row * lanes + col                     # block-local, loop-invariant
        _accumulate(jnp.where(idx < rem, fl, 0.0))

    @pl.when(jnp.logical_not(needs_mask))
    def _unmasked():
        _accumulate(fl)

    @pl.when(j == pl.num_programs(1) - 1)
    def _finalize():
        total = jnp.sum(acc_ref[...])               # once-per-part XLU reduce
        if float(scale) != 1.0:
            total = total * jnp.float32(scale)      # 'mean': fold 1/n in-kernel
        out_ref[...] = jnp.broadcast_to(total, out_ref.shape)


def _choose_lanes(n):
    """Largest lane width in {1024, 512, 256, 128} dividing n (zero-copy)."""
    for lanes in (1024, 512, 256, 128):
        if n % lanes == 0:
            return lanes, 0
    # Fallback: pad to the next multiple of 128.
    return 128, (-n) % 128


def _flatten_2d(ce_loss):
    """Flatten to (rows, lanes); zero-copy whenever n % 128 == 0."""
    n = ce_loss.size
    lanes, pad = _choose_lanes(n)
    flat = ce_loss.reshape(-1)
    if pad:
        # TODO(synk): n % 128 != 0 still pays a whole-array pad copy; a 1-D
        # ragged (BoundedSlice) layout would avoid it entirely.
        flat = jnp.pad(flat, (0, pad))
    rows = flat.shape[0] // lanes
    return flat.reshape(rows, lanes), n, lanes, pad


def _block_rows(rows, lanes, target_bytes):
    br = max(target_bytes // (4 * lanes), 8)
    br -= br % 8                                  # keep multiple of 8
    # If the whole array fits in one block, use the full extent (allowed even
    # when rows % 8 != 0: block dim equals the array dim).
    return rows if rows <= br else br


def focal_loss(ce_loss, reduction, alpha=ALPHA, gamma=GAMMA):
    """Pallas implementation of FocalLoss.forward(ce_loss, reduction)."""
    orig_shape = ce_loss.shape
    orig_dtype = ce_loss.dtype
    n_valid = ce_loss.size

    if n_valid == 0:
        if reduction == "mean":
            return jnp.array(jnp.nan, orig_dtype)
        if reduction == "sum":
            return jnp.array(0, orig_dtype)
        return ce_loss
    if n_valid >= (1 << 31) - (1 << 24):
        raise ValueError("focal_loss: element count too large for int32 "
                         "in-kernel indexing")

    ce2d, n_valid, lanes, pad = _flatten_2d(ce_loss)
    rows = ce2d.shape[0]

    if reduction in ("mean", "sum"):
        block_rows = _block_rows(rows, lanes, _REDUCE_BLOCK_BYTES)
        block_elems = block_rows * lanes
        num_blocks = _cdiv(rows, block_rows)
        acc_sublanes = 8 if block_rows % 8 == 0 else 1

        num_parts = min(_num_tensorcores(), num_blocks)
        blocks_per_part = _cdiv(num_blocks, num_parts)
        num_full_blocks = n_valid // block_elems      # blocks needing no mask
        scale = (1.0 / n_valid) if reduction == "mean" else 1.0

        kernel = functools.partial(
            _focal_reduce_kernel, alpha=alpha, gamma=gamma, scale=scale,
            n_valid=n_valid, block_elems=block_elems,
            blocks_per_part=blocks_per_part, num_full_blocks=num_full_blocks,
            lanes=lanes, acc_sublanes=acc_sublanes)

        def in_map(p, j):
            # Clamp so every DMA stays in bounds; clamped (duplicated) blocks
            # satisfy b >= num_full_blocks and are zeroed by the mask.
            return (jnp.minimum(p * blocks_per_part + j, num_blocks - 1), 0)

        cost = pl.CostEstimate(
            flops=6 * n_valid, transcendentals=n_valid,
            bytes_accessed=int(ce2d.size) * ce2d.dtype.itemsize)

        partials = pl.pallas_call(
            kernel,
            out_shape=jax.ShapeDtypeStruct((num_parts, 1, 1), jnp.float32),
            grid_spec=pltpu.PrefetchScalarGridSpec(
                num_scalar_prefetch=0,
                grid=(num_parts, blocks_per_part),
                in_specs=[pl.BlockSpec((block_rows, lanes), in_map)],
                out_specs=pl.BlockSpec((1, 1, 1), lambda p, j: (p, 0, 0)),
                scratch_shapes=[pltpu.VMEM((acc_sublanes, lanes), jnp.float32)],
            ),
            compiler_params=pltpu.CompilerParams(
                dimension_semantics=("parallel", "arbitrary")),
            cost_estimate=cost,
        )(ce2d)

        # Tiny: (num_parts, 1, 1) -> scalar; the 1/n mean scaling is in-kernel.
        return jnp.sum(partials).astype(orig_dtype)

    # reduction == 'none' (elementwise output)
    block_rows = _block_rows(rows, lanes, _ELEM_BLOCK_BYTES)
    num_blocks = _cdiv(rows, block_rows)

    kernel = functools.partial(_focal_elem_kernel, alpha=alpha, gamma=gamma)
    nbytes = int(ce2d.size) * ce2d.dtype.itemsize
    cost = pl.CostEstimate(flops=6 * n_valid, transcendentals=n_valid,
                           bytes_accessed=2 * nbytes)

    out2d = pl.pallas_call(
        kernel,
        out_shape=jax.ShapeDtypeStruct((rows, lanes), orig_dtype),
        grid_spec=pltpu.PrefetchScalarGridSpec(
            num_scalar_prefetch=0,
            grid=(num_blocks,),
            in_specs=[pl.BlockSpec((block_rows, lanes), lambda i: (i, 0))],
            out_specs=pl.BlockSpec((block_rows, lanes), lambda i: (i, 0)),
        ),
        compiler_params=pltpu.CompilerParams(
            dimension_semantics=("parallel",)),
        cost_estimate=cost,
    )(ce2d)

    if pad:
        # TODO(synk): unaligned (n % 128 != 0) sizes still pay pad + slice.
        return out2d.reshape(-1)[:n_valid].reshape(orig_shape)
    return out2d.reshape(orig_shape)


def _reference(ce_loss, reduction, alpha=ALPHA, gamma=GAMMA):
    pt = jnp.exp(-ce_loss)
    fl = alpha * (1.0 - pt) ** gamma * ce_loss
    if reduction == "mean":
        return fl.mean()
    elif reduction == "sum":
        return fl.sum()
    return fl


if __name__ == "__main__":
    key = jax.random.PRNGKey(0)
    k1, k2, k3, k4 = jax.random.split(key, 4)

    cases = (
        # Small CE-loss map: n=512 -> lanes=512, single tiny block.
        ("small", jax.random.uniform(k1, (2, 16, 16), jnp.float32, maxval=3.0)),
        # Multi-block: lanes=1024, 2 blocks, ragged tail block (masked path),
        # and the core-parallel split on multi-TC chips.
        ("multiblock", jax.random.uniform(k2, (1, 1100, 1024), jnp.float32,
                                          maxval=3.0)),
        # n divisible by 128 only -> lanes=128, rows=17 (non-multiple-of-8,
        # zero-copy, (1, lanes) accumulator path).
        ("lanes128", jax.random.uniform(k3, (2, 4, 16, 17), jnp.float32,
                                        maxval=3.0)),
        # n % 128 != 0 -> pad fallback path.
        ("ragged", jax.random.uniform(k4, (3, 7, 50), jnp.float32, maxval=3.0)),
    )

    for name, ce in cases:
        out_mean = jax.block_until_ready(focal_loss(ce, "mean"))
        out_sum = jax.block_until_ready(focal_loss(ce, "sum"))
        out_none = jax.block_until_ready(focal_loss(ce, "none"))

        ref_mean = _reference(ce, "mean")
        ref_sum = _reference(ce, "sum")
        ref_none = _reference(ce, "none")

        assert out_none.shape == ce.shape, name
        assert jnp.allclose(out_mean, ref_mean, rtol=1e-4, atol=1e-5), name
        assert jnp.allclose(out_sum, ref_sum, rtol=1e-4, atol=1e-2), name
        assert jnp.allclose(out_none, ref_none, rtol=1e-5, atol=1e-5), name

    print("KERNEL_OK")
</pallas_src>

<mosaic_0001>
module attributes {stable_mosaic.version = 11 : i64} {
  func.func @_focal_reduce_kernel(%arg0: i32, %arg1: i32, %arg2: memref<1x512xf32, #tpu.memory_space<vmem>>, %arg3: memref<1x1x1xf32, #tpu.memory_space<vmem>>, %arg4: memref<1x512xf32, #tpu.memory_space<vmem>>) attributes {dimension_semantics = [#tpu.dimension_semantics<parallel>, #tpu.dimension_semantics<arbitrary>], iteration_bounds = array<i64: 1, 1>, scalar_prefetch = 0 : i64, scratch_operands = 1 : i64, tpu.core_type = #tpu.core_type<tc>, window_params = [{transform_indices = @transform_0, window_bounds = array<i64: 1, 512>}, {transform_indices = @transform_1, window_bounds = array<i64: 1, 1, 1>}]} {
    %c0_i32 = arith.constant 0 : i32
    %0 = arith.cmpi eq, %arg1, %c0_i32 : i32
    %1 = arith.extui %0 : i1 to i32
    %c0_i32_0 = arith.constant 0 : i32
    %2 = arith.cmpi ne, %1, %c0_i32_0 : i32
    scf.if %2 {
      %cst_8 = arith.constant 0.000000e+00 : f32
      %22 = vector.broadcast %cst_8 : f32 to vector<1x512xf32>
      %c0_9 = arith.constant 0 : index
      %c0_10 = arith.constant 0 : index
      %23 = vector.load %arg4[%c0_9, %c0_10] : memref<1x512xf32, #tpu.memory_space<vmem>>, vector<1x512xf32>
      tpu.vector_store %arg4[%c0_9, %c0_10], %22 {strides = array<i32>} : memref<1x512xf32, #tpu.memory_space<vmem>>, vector<1x512xf32>,
    } else {
    }
    %c0 = arith.constant 0 : index
    %c0_1 = arith.constant 0 : index
    %3 = vector.load %arg2[%c0, %c0_1] : memref<1x512xf32, #tpu.memory_space<vmem>>, vector<1x512xf32>
    %cst = arith.constant 0.000000e+00 : f32
    %4 = vector.broadcast %cst : f32 to vector<1x512xf32>
    %5 = arith.subf %4, %3 : vector<1x512xf32>
    %6 = math.exp %5 : vector<1x512xf32>
    %cst_2 = arith.constant 1.000000e+00 : f32
    %7 = vector.broadcast %cst_2 : f32 to vector<1x512xf32>
    %8 = arith.subf %7, %6 : vector<1x512xf32>
    %9 = arith.mulf %8, %8 : vector<1x512xf32>
    %10 = arith.mulf %9, %3 : vector<1x512xf32>
    %c1_i32 = arith.constant 1 : i32
    %11 = arith.muli %arg0, %c1_i32 : i32
    %12 = arith.addi %11, %arg1 : i32
    %c1_i32_3 = arith.constant 1 : i32
    %13 = arith.cmpi sge, %12, %c1_i32_3 : i32
    %14 = arith.extui %13 : i1 to i32
    %c0_i32_4 = arith.constant 0 : i32
    %15 = arith.cmpi ne, %14, %c0_i32_4 : i32
    scf.if %15 {
      %c512_i32 = arith.constant 512 : i32
      %22 = arith.muli %12, %c512_i32 : i32
      %c512_i32_8 = arith.constant 512 : i32
      %23 = arith.subi %c512_i32_8, %22 : i32
      %24 = tpu.iota {dimensions = array<i32: 0>} : vector<1x512xi32>
      %25 = tpu.iota {dimensions = array<i32: 1>} : vector<1x512xi32>
      %c512_i32_9 = arith.constant 512 : i32
      %26 = vector.broadcast %c512_i32_9 : i32 to vector<1x512xi32>
      %27 = arith.muli %24, %26 : vector<1x512xi32>
      %28 = arith.addi %27, %25 : vector<1x512xi32>
      %29 = vector.broadcast %23 : i32 to vector<1x512xi32>
      %30 = arith.cmpi slt, %28, %29 : vector<1x512xi32>
      %cst_10 = arith.constant 0.000000e+00 : f32
      %31 = vector.broadcast %cst_10 : f32 to vector<1x512xf32>
      %32 = arith.select %30, %10, %31 : vector<1x512xi1>, vector<1x512xf32>
      %c0_11 = arith.constant 0 : index
      %c0_12 = arith.constant 0 : index
      %33 = vector.load %arg4[%c0_11, %c0_12] : memref<1x512xf32, #tpu.memory_space<vmem>>, vector<1x512xf32>
      %cst_13 = arith.constant dense<0.000000e+00> : vector<512xf32>
      %34 = vector.multi_reduction <add>, %32, %cst_13 [0] : vector<1x512xf32> to vector<512xf32>
      %35 = vector.shape_cast %34 : vector<512xf32> to vector<1x512xf32>
      %36 = arith.addf %33, %35 : vector<1x512xf32>
      %c0_14 = arith.constant 0 : index
      %c0_15 = arith.constant 0 : index
      %37 = vector.load %arg4[%c0_14, %c0_15] : memref<1x512xf32, #tpu.memory_space<vmem>>, vector<1x512xf32>
      tpu.vector_store %arg4[%c0_14, %c0_15], %36 {strides = array<i32>} : memref<1x512xf32, #tpu.memory_space<vmem>>, vector<1x512xf32>,
    } else {
    }
    %true = arith.constant true
    %16 = arith.xori %13, %true : i1
    %17 = arith.extui %16 : i1 to i32
    %c0_i32_5 = arith.constant 0 : i32
    %18 = arith.cmpi ne, %17, %c0_i32_5 : i32
    scf.if %18 {
      %c0_8 = arith.constant 0 : index
      %c0_9 = arith.constant 0 : index
      %22 = vector.load %arg4[%c0_8, %c0_9] : memref<1x512xf32, #tpu.memory_space<vmem>>, vector<1x512xf32>
      %cst_10 = arith.constant dense<0.000000e+00> : vector<512xf32>
      %23 = vector.multi_reduction <add>, %10, %cst_10 [0] : vector<1x512xf32> to vector<512xf32>
      %24 = vector.shape_cast %23 : vector<512xf32> to vector<1x512xf32>
      %25 = arith.addf %22, %24 : vector<1x512xf32>
      %c0_11 = arith.constant 0 : index
      %c0_12 = arith.constant 0 : index
      %26 = vector.load %arg4[%c0_11, %c0_12] : memref<1x512xf32, #tpu.memory_space<vmem>>, vector<1x512xf32>
      tpu.vector_store %arg4[%c0_11, %c0_12], %25 {strides = array<i32>} : memref<1x512xf32, #tpu.memory_space<vmem>>, vector<1x512xf32>,
    } else {
    }
    %c0_i32_6 = arith.constant 0 : i32
    %19 = arith.cmpi eq, %arg1, %c0_i32_6 : i32
    %20 = arith.extui %19 : i1 to i32
    %c0_i32_7 = arith.constant 0 : i32
    %21 = arith.cmpi ne, %20, %c0_i32_7 : i32
    scf.if %21 {
      %c0_8 = arith.constant 0 : index
      %c0_9 = arith.constant 0 : index
      %22 = vector.load %arg4[%c0_8, %c0_9] : memref<1x512xf32, #tpu.memory_space<vmem>>, vector<1x512xf32>
      %23 = vector.shape_cast %22 : vector<1x512xf32> to vector<1x1x512xf32>
      %cst_10 = arith.constant dense<0.000000e+00> : vector<1xf32>
      %24 = vector.multi_reduction <add>, %23, %cst_10 [1, 2] : vector<1x1x512xf32> to vector<1xf32>
      %25 = vector.shape_cast %24 : vector<1xf32> to vector<1x1x1xf32>
      %26 = vector.extract %25[0, 0, 0] : f32 from vector<1x1x1xf32>
      %cst_11 = arith.constant 0.001953125 : f32
      %27 = arith.mulf %26, %cst_11 : f32
      %28 = vector.broadcast %27 : f32 to vector<1x1x1xf32>
      %c0_12 = arith.constant 0 : index
      %c0_13 = arith.constant 0 : index
      %c0_14 = arith.constant 0 : index
      %29 = vector.load %arg3[%c0_12, %c0_13, %c0_14] : memref<1x1x1xf32, #tpu.memory_space<vmem>>, vector<1x1x1xf32>
      tpu.vector_store %arg3[%c0_12, %c0_13, %c0_14], %28 {strides = array<i32>} : memref<1x1x1xf32, #tpu.memory_space<vmem>>, vector<1x1x1xf32>,
    } else {
    }
    return
  }
  func.func @transform_0(%arg0: i32, %arg1: i32) -> (i32, i32) {
    %c1_i32 = arith.constant 1 : i32
    %0 = arith.muli %arg0, %c1_i32 : i32
    %1 = arith.addi %0, %arg1 : i32
    %c0_i32 = arith.constant 0 : i32
    %2 = arith.minsi %1, %c0_i32 : i32
    %c0_i32_0 = arith.constant 0 : i32
    %c0_i32_1 = arith.constant 0 : i32
    return %2, %c0_i32_0 : i32, i32
  }
  func.func @transform_1(%arg0: i32, %arg1: i32) -> (i32, i32, i32) {
    %c0_i32 = arith.constant 0 : i32
    %c0_i32_0 = arith.constant 0 : i32
    %c0_i32_1 = arith.constant 0 : i32
    return %arg0, %c0_i32, %c0_i32_0 : i32, i32, i32
  }
}

</mosaic_0001>

<bundles_post_ra>
// kernel: tpu_custom_call.1
= control target key start
LH: loop header
LB: loop body
LE: loop exit
PB: predicated region body
PF: predicated region fallthrough
CT: control target
= control target key end

     0   :  { %6 = vsyncpa [#allocation4], 0  ;;  %s302_s0 = inlined_call_operand.hbm [shape: f32[1,512], index: 0, kind: input, shape index: {}]   ;;  %s303_s1 = inlined_call_operand.hbm [shape: f32[1,1,1], index: 1, kind: output, shape index: {}]  }
   0x1   :  { %7 = vsyncpa [#allocation5], 0  ;;  %s265_s6 = smov [#allocation3]   ;;  %s217_s10 = scalar_lea.hbm %s302_s0, 64 }
   0x2   :  { %s20_s7 = sshll.u32 %s265_s6, 4  ;;  %p218_p0 = scmp.ne.s32.totalorder %s302_s0, %s217_s10  ;;  %s21_s7 = int_to_ptr.vmem [resolvable:$true] %s20_s7 }
   0x3   :  { %p221_p1 = scmp.lt.u32.totalorder %s217_s10, %s302_s0 }
   0x5   :  { %p223_p2 = pnand %p221_p1, %p218_p0 }
   0x7   :  { %226 = shalt.err (!%p223_p2)
}
   0x8   :  { %s227_s15 = scalar_lea.vmem %s21_s7, 64  ;;  %p232_p4 = scmp.lt.s32.totalorder %s21_s7, %s21_s7 }
   0x9   :  { %p228_p3 = scmp.ne.s32.totalorder %s21_s7, %s227_s15  ;;  %p233_p5 = scmp.lt.s32.totalorder %s227_s15, %s227_s15 }
   0xb   :  { %p234_p6 = por %p233_p5, %p232_p4 }
   0xd   :  { %p235_p7 = pnand %p234_p6, %p228_p3 }
   0xf   :  { %238 = shalt.err (!%p235_p7)
}
  0x10   :  { %23 = dma.hbm_to_vmem [thread:$0]  %s302_s0, 64, %s21_s7, [#allocation4]  }
  0x11   :  { %261 = dma.done.wait [#allocation4], 64  }
  0x12   :  { %262 = vsyncadd [#allocation4], 4294967232  ;;  %v34_v0 = vlaneseq  ;;  %v266_v1 = vmov 0.0   ;;  %v39_v2 = vld [vmem:[#allocation3] sm:$0xf]  ;;  %vm172_vm1 = vcmask 1040384  }
  0x13   :  { %v40_v3 = vsub.f32 0.0, %v39_v2  ;;  %s267_s0 = smov [#allocation6]   ;;  %vm191_vm2 = vcmask 0  }
  0x14   :  { %vm36_vm0 = vcmp.lt.s32.totalorder %v34_v0, 512  ;;  %v153_v11 = vshrl.u32 %v34_v0, 7  ;;  %s199_s18 = sshll.u32 %s267_s0, 4  ;;  %s200_s18 = int_to_ptr.vmem [resolvable:$true] %s199_s18 }
  0x15   :  { %38 = vst.msk [vmem:[#allocation2] sm:$0xf] %vm36_vm0, %v266_v1  ;;  %v41_v4 = vmul.f32 1.442695, %v40_v3  ;;  %s239_s21 = scalar_lea.vmem %s200_s18, 16  ;;  %s243_s22 = scalar_lea.vmem %s200_s18, 32 }
  0x16   :  { %v154_v12 = vsub.s32 0, %v153_v11  ;;  %v158_v13 = vsub.s32 1, %v153_v11  ;;  %v162_v14 = vsub.s32 2, %v153_v11  ;;  %v166_v15 = vsub.s32 3, %v153_v11  ;;  %p240_p8 = scmp.ne.s32.totalorder %s200_s18, %s239_s21  ;;  %p244_p9 = scmp.lt.s32.totalorder %s200_s18, %s200_s18 }
  0x17   :  { %215 = vpow2.f32 %v41_v4  ;;  %p245_p10 = scmp.lt.s32.totalorder %s243_s22, %s239_s21 }
  0x19   :  { %p246_p11 = por %p245_p10, %p244_p9 }
  0x1b   :  { %p247_p12 = pnand %p246_p11, %p240_p8 }
  0x1c   :  { %v139_v8 = vld [vmem:[#allocation2] sm:$0xf] }
  0x21   :  { %v216_v5 = vpop.eup %215 }
  0x22   :  { %v43_v6 = vsub.f32 1.0, %v216_v5 }
  0x24   :  { %v44_v7 = vmul.f32 %v43_v6, %v43_v6 }
  0x26   :  { %v45_v9 = vmul.f32 %v44_v7, %v39_v2 }
  0x28   :  { %v141_v10 = vadd.f32 %v139_v8, %v45_v9 }
  0x2a   :  { %146 = vst.msk [vmem:[#allocation2] sm:$0xf] %vm36_vm0, %v141_v10 }
  0x31   :  { %v150_v16 = vld [vmem:[#allocation2] sm:$0xf] }
  0x32   :  { %v155_v17 = vrot.slane %v150_v16, %v154_v12  ;;  %v159_v18 = vrot.slane %v150_v16, %v158_v13  ;;  %v163_v19 = vrot.slane %v150_v16, %v162_v14  ;;  %v167_v20 = vrot.slane %v150_v16, %v166_v15 }
  0x34   :  { %v173_v21 = vsel %vm172_vm1, %v155_v17, 0.0  ;;  %v174_v22 = vsel %vm172_vm1, %v159_v18, 0.0  ;;  %v176_v23 = vsel %vm172_vm1, %v163_v19, 0.0  ;;  %v178_v25 = vsel %vm172_vm1, %v167_v20, 0.0 }
  0x35   :  { %v175_v24 = vadd.f32 %v174_v22, %v173_v21 }
  0x37   :  { %v177_v26 = vadd.f32 %v176_v23, %v175_v24 }
  0x39   :  { %v179_v27 = vadd.f32 %v178_v25, %v177_v26 }
  0x3b   :  { %180 = vadd.xlane.f32.xlu0 %v179_v27 }
  0xc8   :  { %v181_v28 = vpop.xlane.xlu0 %180 }
  0xc9   :  { %v182_v29 = vrot.slane %v181_v28, 4 }
  0xcb   :  { %v183_v30 = vadd.f32 %v182_v29, %v181_v28 }
  0xcd   :  { %v184_v31 = vrot.slane %v183_v30, 2 }
  0xcf   :  { %v185_v32 = vadd.f32 %v184_v31, %v183_v30 }
  0xd1   :  { %v186_v33 = vrot.slane %v185_v32, 1 }
  0xd3   :  { %v187_v34 = vadd.f32 %v186_v33, %v185_v32 }
  0xd5   :  { %210 = vpush %v187_v34 }
 0x106   :  { %s211_s19 = spop %210 }
 0x107   :  { %s189_s20 = smul.f32 0.001953125, %s211_s19 }
 0x109   :  { %v190_v35 = vstv %s189_s20 }
 0x10a   :  { %192 = vst.msk [vmem:[#allocation6] sm:$0x1] %vm191_vm2, %v190_v35 }
 0x10b   :  { %250 = shalt.err (!%p247_p12)
}
 0x10c   :  { %s251_s25 = scalar_lea.hbm %s303_s1, 16 }
 0x10d   :  { %p252_p13 = scmp.ne.s32.totalorder %s303_s1, %s251_s25  ;;  %p255_p0 = scmp.lt.u32.totalorder %s251_s25, %s303_s1 }
 0x10f   :  { %p257_p1 = pnand %p255_p0, %p252_p13 }
 0x111   :  { %260 = shalt.err (!%p257_p1)
}
 0x112   :  { %202 = dma.vmem_to_hbm [thread:$0]  %s200_s18, 16, %s303_s1, [#allocation5]  }
 0x113   :  { %263 = dma.done.wait [#allocation5], 16  }
 0x114   :  { %264 = vsyncadd [#allocation5], 4294967280 }
 0x115   :  { %206 = vsyncpa [#allocation4], 1 }
 0x116   :  { %207 = vsyncpa [#allocation5], 1 }

</bundles_post_ra>
